<compile_context>
chip_gen: v7x
topology: tpu7x:2x2x1
jax: 0.10.0
libtpu: 0.0.40
codegen_flags: <defaults>
</compile_context>

<pallas_src>
import functools
import math

import jax
import jax.numpy as jnp
from jax.experimental import pallas as pl
from jax.experimental.pallas import tpu as pltpu


def _round_up(x, m):
    return ((x + m - 1) // m) * m


_VMEM_PHYS_CACHE = []


def _vmem_phys_bytes():
    """Physical VMEM per TensorCore (conservative 64 MiB fallback = v7x)."""
    if not _VMEM_PHYS_CACHE:
        phys = 64 * 1024 * 1024
        try:
            info = pltpu.get_tpu_info()
            for name in ("vmem_capacity_bytes", "vmem_bytes", "vmem_size_bytes"):
                v = getattr(info, name, None)
                if v:
                    phys = int(v)
                    break
        except Exception:
            pass
        _VMEM_PHYS_CACHE.append(phys)
    return _VMEM_PHYS_CACHE[0]


def _gelu(x, approx):
    if approx:
        # tanh approximation -> one EUP tanh on v6e/v7x instead of the erf VALU polynomial.
        return jax.nn.gelu(x, approximate=True)
    # Matches torch.nn.GELU() default (erf-based). x is f32 here.
    return 0.5 * x * (1.0 + jax.lax.erf(x * (1.0 / math.sqrt(2.0))))


# ----------------------------------------------------------------------------- kernels


def _mlp_fused_kernel(x_ref, w1_ref, b1_ref, w2_ref, b2_ref, o_ref, *, approx_gelu):
    # Fast path: weights fully resident in VMEM, grid = (row tiles,).
    xv = x_ref[...].astype(w1_ref.dtype)                       # bf16 MXU feed if params are bf16
    h = jnp.dot(xv, w1_ref[...], preferred_element_type=jnp.float32)
    h = _gelu(h + b1_ref[...].astype(jnp.float32), approx_gelu)
    y = jnp.dot(h.astype(w2_ref.dtype), w2_ref[...], preferred_element_type=jnp.float32)
    o_ref[...] = (y + b2_ref[...].astype(jnp.float32)).astype(o_ref.dtype)


def _mlp_stream_kernel(x_ref, w1_ref, b1_ref, w2_ref, b2_ref, o_ref, acc_ref, *, approx_gelu):
    # Streaming path: hidden axis is the innermost ("arbitrary") grid axis; f32 accumulator.
    j = pl.program_id(1)

    @pl.when(j == 0)
    def _init():
        acc_ref[...] = jnp.zeros_like(acc_ref)

    xv = x_ref[...].astype(w1_ref.dtype)
    h = jnp.dot(xv, w1_ref[...], preferred_element_type=jnp.float32)
    h = _gelu(h + b1_ref[...].astype(jnp.float32), approx_gelu)
    acc_ref[...] += jnp.dot(h.astype(w2_ref.dtype), w2_ref[...],
                            preferred_element_type=jnp.float32)

    @pl.when(j == pl.num_programs(1) - 1)
    def _finalize():
        o_ref[...] = (acc_ref[...] + b2_ref[...].astype(jnp.float32)).astype(o_ref.dtype)


# ----------------------------------------------------------------------------- wrapper


def pad_mlp_params(w1, b1, w2, b2, compute_dtype=None):
    """Pad weights ONCE (outside the hot path) to lane-dense (x128) shapes.

    compute_dtype=jnp.bfloat16 casts the weight matrices for bf16 MXU throughput on
    v6e/v7x (biases stay f32; accumulation is f32 either way).  Padded hidden columns are
    zero so gelu(0)=0 contributes nothing; padded output lanes are sliced off on return.
    """
    C, H = w1.shape
    O = w2.shape[1]
    H_pad = _round_up(H, 128)
    O_pad = _round_up(O, 128)
    w1p = jnp.pad(w1, ((0, 0), (0, H_pad - H)))
    b1p = jnp.pad(b1, (0, H_pad - H)).reshape(1, H_pad)
    w2p = jnp.pad(w2, ((0, H_pad - H), (0, O_pad - O)))
    b2p = jnp.pad(b2, (0, O_pad - O)).reshape(1, O_pad)
    if compute_dtype is not None:
        w1p = w1p.astype(compute_dtype)
        w2p = w2p.astype(compute_dtype)
    return w1p, b1p, w2p, b2p


@functools.partial(
    jax.jit,
    static_argnames=("out_features", "tm", "th", "approx_gelu", "force_streaming"))
def mlp_forward(x, w1p, b1p, w2p, b2p, out_features, tm=512, th=512,
                approx_gelu=False, force_streaming=False):
    """Fused fc1 -> GELU -> fc2 (dropout p=0 is identity).  x: (B, N, C) -> (B, N, O)."""
    B, N, C = x.shape
    H_pad = w1p.shape[1]
    O_pad = w2p.shape[1]
    O = out_features
    M = B * N
    out_dtype = x.dtype

    in_b = x.dtype.itemsize
    w_b = w1p.dtype.itemsize
    out_b = out_dtype.itemsize

    phys = _vmem_phys_bytes()
    usable = int(phys * 0.8)        # headroom for Mosaic internal scratch / compiler temps

    # Row tile: as large as VMEM allows, but ensure >=2 row tiles when M allows so both
    # v7x TensorCores get "parallel" work (near-free on single-TC v5e/v6e).
    tm_eff = max(8, min(tm, _round_up(pl.cdiv(M, 2), 8)))

    # Conservative per-step footprints (inputs/outputs counted double-buffered).
    def fast_fp(t):
        return (2 * (t * C * in_b + C * H_pad * w_b + H_pad * w_b
                     + H_pad * O_pad * w_b + O_pad * w_b + t * O_pad * out_b)
                + t * H_pad * 4)                                 # f32 h intermediate

    def stream_fp(t, tk):
        return (2 * (t * C * in_b + C * tk * w_b + tk * w_b
                     + tk * O_pad * w_b + O_pad * w_b + t * O_pad * out_b)
                + t * O_pad * 4                                  # f32 acc scratch
                + t * tk * 4)                                    # f32 h intermediate

    use_fast = not force_streaming
    tmf = tm_eff
    if use_fast:
        while fast_fp(tmf) > usable and tmf > 8:
            tmf = max(8, _round_up(tmf // 2, 8))
        use_fast = fast_fp(tmf) <= usable

    x2d = x.reshape(M, C)

    if use_fast:
        # ------------------------------------------------ fast path: resident weights
        tm_eff = tmf
        M_pad = _round_up(M, tm_eff)
        if M_pad != M:
            x2d = jnp.pad(x2d, ((0, M_pad - M), (0, 0)))
        grid = (M_pad // tm_eff,)

        fp = fast_fp(tm_eff)
        vmem_limit = int(min(usable, max(32 << 20, int(fp * 1.25) + (4 << 20))))

        cost = pl.CostEstimate(
            flops=2 * M * C * H_pad + 2 * M * H_pad * O_pad,
            transcendentals=M * H_pad,
            bytes_accessed=(x2d.size * in_b
                            + (w1p.size + w2p.size) * w_b
                            + (b1p.size + b2p.size) * b1p.dtype.itemsize
                            + M_pad * O_pad * out_b),
        )

        out2d = pl.pallas_call(
            functools.partial(_mlp_fused_kernel, approx_gelu=approx_gelu),
            out_shape=jax.ShapeDtypeStruct((M_pad, O_pad), out_dtype),
            grid_spec=pltpu.PrefetchScalarGridSpec(
                num_scalar_prefetch=0,
                grid=grid,
                in_specs=[
                    pl.BlockSpec((tm_eff, C), lambda i: (i, 0)),      # x rows
                    pl.BlockSpec((C, H_pad), lambda i: (0, 0)),       # W1 (grid-invariant)
                    pl.BlockSpec((1, H_pad), lambda i: (0, 0)),       # b1
                    pl.BlockSpec((H_pad, O_pad), lambda i: (0, 0)),   # W2 (grid-invariant)
                    pl.BlockSpec((1, O_pad), lambda i: (0, 0)),       # b2
                ],
                out_specs=pl.BlockSpec((tm_eff, O_pad), lambda i: (i, 0)),
            ),
            compiler_params=pltpu.CompilerParams(
                dimension_semantics=("parallel",),
                vmem_limit_bytes=vmem_limit,
            ),
            cost_estimate=cost,
        )(x2d, w1p, b1p, w2p, b2p)
    else:
        # ------------------------------------------------ streaming path: tile hidden dim
        # th must be a 128-multiple divisor of H_pad (padded hidden cols must stay zero).
        th_eff = min(_round_up(th, 128), H_pad)
        while H_pad % th_eff != 0:
            th_eff -= 128
        tms = tm_eff
        while stream_fp(tms, th_eff) > usable and (tms > 8 or th_eff > 128):
            if tms > 8:
                tms = max(8, _round_up(tms // 2, 8))
            else:
                th_eff = max(128, (th_eff // 2) // 128 * 128)
                while H_pad % th_eff != 0:
                    th_eff -= 128
        tm_eff = tms

        M_pad = _round_up(M, tm_eff)
        if M_pad != M:
            x2d = jnp.pad(x2d, ((0, M_pad - M), (0, 0)))
        grid = (M_pad // tm_eff, H_pad // th_eff)

        fp = stream_fp(tm_eff, th_eff)
        vmem_limit = int(min(usable, max(32 << 20, int(fp * 1.25) + (4 << 20))))

        cost = pl.CostEstimate(
            flops=2 * M * C * H_pad + 2 * M * H_pad * O_pad,
            transcendentals=M * H_pad,
            bytes_accessed=(x2d.size * in_b
                            + grid[0] * (w1p.size + w2p.size) * w_b       # weights re-read per row tile
                            + grid[0] * (b1p.size + b2p.size) * b1p.dtype.itemsize
                            + M_pad * O_pad * out_b),
        )

        out2d = pl.pallas_call(
            functools.partial(_mlp_stream_kernel, approx_gelu=approx_gelu),
            out_shape=jax.ShapeDtypeStruct((M_pad, O_pad), out_dtype),
            grid_spec=pltpu.PrefetchScalarGridSpec(
                num_scalar_prefetch=0,
                grid=grid,
                in_specs=[
                    pl.BlockSpec((tm_eff, C), lambda i, j: (i, 0)),       # x rows (j-invariant)
                    pl.BlockSpec((C, th_eff), lambda i, j: (0, j)),       # W1 hidden slice
                    pl.BlockSpec((1, th_eff), lambda i, j: (0, j)),       # b1 slice
                    pl.BlockSpec((th_eff, O_pad), lambda i, j: (j, 0)),   # W2 hidden slice
                    pl.BlockSpec((1, O_pad), lambda i, j: (0, 0)),        # b2 (invariant)
                ],
                out_specs=pl.BlockSpec((tm_eff, O_pad), lambda i, j: (i, 0)),
                scratch_shapes=[pltpu.VMEM((tm_eff, O_pad), jnp.float32)],
            ),
            compiler_params=pltpu.CompilerParams(
                dimension_semantics=("parallel", "arbitrary"),
                vmem_limit_bytes=vmem_limit,
            ),
            cost_estimate=cost,
        )(x2d, w1p, b1p, w2p, b2p)

    return out2d[:M, :O].reshape(B, N, O)


def init_mlp_params(key, in_features, hidden_features, out_features, dtype=jnp.float32):
    # Deterministic synthetic init mimicking nn.Linear's kaiming-uniform bounds.
    k1, k2, k3, k4 = jax.random.split(key, 4)
    bound1 = 1.0 / (in_features ** 0.5)
    bound2 = 1.0 / (hidden_features ** 0.5)
    w1 = jax.random.uniform(k1, (in_features, hidden_features), dtype, -bound1, bound1)
    b1 = jax.random.uniform(k2, (hidden_features,), dtype, -bound1, bound1)
    w2 = jax.random.uniform(k3, (hidden_features, out_features), dtype, -bound2, bound2)
    b2 = jax.random.uniform(k4, (out_features,), dtype, -bound2, bound2)
    return w1, b1, w2, b2


if __name__ == "__main__":
    key = jax.random.PRNGKey(0)
    kx, kp = jax.random.split(key)

    B, N, C = 2, 64, 32          # batch, tokens, in_features
    H = 4 * C                    # hidden_features
    O = C                        # out_features defaults to in_features

    x = jax.random.normal(kx, (B, N, C), dtype=jnp.float32)
    w1, b1, w2, b2 = init_mlp_params(kp, C, H, O)

    # Pad (and optionally cast) parameters once, outside the hot path.
    # For bf16 MXU feed on v6e/v7x: pad_mlp_params(..., compute_dtype=jnp.bfloat16)
    w1p, b1p, w2p, b2p = pad_mlp_params(w1, b1, w2, b2)

    # Reference in plain JAX (same exact-GELU semantics as torch nn.GELU()).
    h_ref = x.reshape(-1, C) @ w1 + b1
    h_ref = 0.5 * h_ref * (1.0 + jax.lax.erf(h_ref / jnp.sqrt(2.0)))
    y_ref = (h_ref @ w2 + b2).reshape(B, N, O)

    # Fast path (weights VMEM-resident) — the common FocalIR-sized case.
    y = mlp_forward(x, w1p, b1p, w2p, b2p, out_features=O)
    jax.block_until_ready(y)
    assert y.shape == y_ref.shape
    assert jnp.allclose(y, y_ref, atol=1e-5, rtol=1e-5), "fast-path mismatch vs reference"

    # Streaming path (hidden-axis tiled) — exercised here to keep it verified as well.
    y_s = mlp_forward(x, w1p, b1p, w2p, b2p, out_features=O, force_streaming=True)
    jax.block_until_ready(y_s)
    assert jnp.allclose(y_s, y_ref, atol=1e-5, rtol=1e-5), "streaming-path mismatch vs reference"

    print("KERNEL_OK")
</pallas_src>

<mosaic_0001>
module attributes {stable_mosaic.version = 11 : i64} {
  func.func @_mlp_fused_kernel(%arg0: i32, %arg1: memref<64x32xf32, #tpu.memory_space<vmem>>, %arg2: memref<32x128xf32, #tpu.memory_space<vmem>>, %arg3: memref<1x128xf32, #tpu.memory_space<vmem>>, %arg4: memref<128x128xf32, #tpu.memory_space<vmem>>, %arg5: memref<1x128xf32, #tpu.memory_space<vmem>>, %arg6: memref<64x128xf32, #tpu.memory_space<vmem>>) attributes {dimension_semantics = [#tpu.dimension_semantics<parallel>], iteration_bounds = array<i64: 2>, scalar_prefetch = 0 : i64, scratch_operands = 0 : i64, tpu.core_type = #tpu.core_type<tc>, window_params = [{transform_indices = @transform_0, window_bounds = array<i64: 64, 32>}, {pipeline_mode = #tpu.pipeline_mode<synchronous>, transform_indices = @transform_1, window_bounds = array<i64: 32, 128>}, {pipeline_mode = #tpu.pipeline_mode<synchronous>, transform_indices = @transform_2, window_bounds = array<i64: 1, 128>}, {pipeline_mode = #tpu.pipeline_mode<synchronous>, transform_indices = @transform_3, window_bounds = array<i64: 128, 128>}, {pipeline_mode = #tpu.pipeline_mode<synchronous>, transform_indices = @transform_4, window_bounds = array<i64: 1, 128>}, {transform_indices = @transform_5, window_bounds = array<i64: 64, 128>}]} {
    %c0 = arith.constant 0 : index
    %c0_0 = arith.constant 0 : index
    %0 = vector.load %arg1[%c0, %c0_0] : memref<64x32xf32, #tpu.memory_space<vmem>>, vector<64x32xf32>
    %c0_1 = arith.constant 0 : index
    %c0_2 = arith.constant 0 : index
    %1 = vector.load %arg2[%c0_1, %c0_2] : memref<32x128xf32, #tpu.memory_space<vmem>>, vector<32x128xf32>
    %cst = arith.constant dense<0.000000e+00> : vector<64x128xf32>
    %2 = tpu.matmul %0, %1, %cst {dimension_numbers = #tpu.dot_dimension_numbers<[1], [0], [0], [1], [0, 0, 1, 1], [], []>} : vector<64x32xf32>, vector<32x128xf32>, vector<64x128xf32> -> vector<64x128xf32>
    %c0_3 = arith.constant 0 : index
    %c0_4 = arith.constant 0 : index
    %3 = vector.load %arg3[%c0_3, %c0_4] : memref<1x128xf32, #tpu.memory_space<vmem>>, vector<1x128xf32>
    %4 = vector.broadcast %3 : vector<1x128xf32> to vector<64x128xf32>
    %5 = arith.addf %2, %4 : vector<64x128xf32>
    %cst_5 = arith.constant 5.000000e-01 : f32
    %6 = vector.broadcast %cst_5 : f32 to vector<64x128xf32>
    %7 = arith.mulf %6, %5 : vector<64x128xf32>
    %cst_6 = arith.constant 0.707106769 : f32
    %8 = vector.broadcast %cst_6 : f32 to vector<64x128xf32>
    %9 = arith.mulf %5, %8 : vector<64x128xf32>
    %10 = math.erf %9 : vector<64x128xf32>
    %cst_7 = arith.constant 1.000000e+00 : f32
    %11 = vector.broadcast %cst_7 : f32 to vector<64x128xf32>
    %12 = arith.addf %11, %10 : vector<64x128xf32>
    %13 = arith.mulf %7, %12 : vector<64x128xf32>
    %c0_8 = arith.constant 0 : index
    %c0_9 = arith.constant 0 : index
    %14 = vector.load %arg4[%c0_8, %c0_9] : memref<128x128xf32, #tpu.memory_space<vmem>>, vector<128x128xf32>
    %cst_10 = arith.constant dense<0.000000e+00> : vector<64x128xf32>
    %15 = tpu.matmul %13, %14, %cst_10 {dimension_numbers = #tpu.dot_dimension_numbers<[1], [0], [0], [1], [0, 0, 1, 1], [], []>} : vector<64x128xf32>, vector<128x128xf32>, vector<64x128xf32> -> vector<64x128xf32>
    %c0_11 = arith.constant 0 : index
    %c0_12 = arith.constant 0 : index
    %16 = vector.load %arg5[%c0_11, %c0_12] : memref<1x128xf32, #tpu.memory_space<vmem>>, vector<1x128xf32>
    %17 = vector.broadcast %16 : vector<1x128xf32> to vector<64x128xf32>
    %18 = arith.addf %15, %17 : vector<64x128xf32>
    %c0_13 = arith.constant 0 : index
    %c0_14 = arith.constant 0 : index
    %19 = vector.load %arg6[%c0_13, %c0_14] : memref<64x128xf32, #tpu.memory_space<vmem>>, vector<64x128xf32>
    tpu.vector_store %arg6[%c0_13, %c0_14], %18 {strides = array<i32>} : memref<64x128xf32, #tpu.memory_space<vmem>>, vector<64x128xf32>,
    return
  }
  func.func @transform_0(%arg0: i32) -> (i32, i32) {
    %c0_i32 = arith.constant 0 : i32
    %c0_i32_0 = arith.constant 0 : i32
    return %arg0, %c0_i32 : i32, i32
  }
  func.func @transform_1(%arg0: i32) -> (i32, i32) {
    %c0_i32 = arith.constant 0 : i32
    %c0_i32_0 = arith.constant 0 : i32
    %c0_i32_1 = arith.constant 0 : i32
    return %c0_i32, %c0_i32_0 : i32, i32
  }
  func.func @transform_2(%arg0: i32) -> (i32, i32) {
    %c0_i32 = arith.constant 0 : i32
    %c0_i32_0 = arith.constant 0 : i32
    %c0_i32_1 = arith.constant 0 : i32
    return %c0_i32, %c0_i32_0 : i32, i32
  }
  func.func @transform_3(%arg0: i32) -> (i32, i32) {
    %c0_i32 = arith.constant 0 : i32
    %c0_i32_0 = arith.constant 0 : i32
    %c0_i32_1 = arith.constant 0 : i32
    return %c0_i32, %c0_i32_0 : i32, i32
  }
  func.func @transform_4(%arg0: i32) -> (i32, i32) {
    %c0_i32 = arith.constant 0 : i32
    %c0_i32_0 = arith.constant 0 : i32
    %c0_i32_1 = arith.constant 0 : i32
    return %c0_i32, %c0_i32_0 : i32, i32
  }
  func.func @transform_5(%arg0: i32) -> (i32, i32) {
    %c0_i32 = arith.constant 0 : i32
    %c0_i32_0 = arith.constant 0 : i32
    return %arg0, %c0_i32 : i32, i32
  }
}

</mosaic_0001>

<bundles_post_ra>
// kernel: mlp_forward.1
= control target key start
LH: loop header
LB: loop body
LE: loop exit
PB: predicated region body
PF: predicated region fallthrough
CT: control target
= control target key end

     0   :  { %s848_s18 = smov 0   ;;  %s946_s0 = inlined_call_operand.vmem [shape: f32[128,32], index: 0, kind: input, shape index: {}]   ;;  %s947_s1 = inlined_call_operand.vmem [shape: f32[32,128], index: 1, kind: input, shape index: {}]   ;;  %s948_s2 = inlined_call_operand.vmem [shape: f32[1,128], index: 2, kind: input, shape index: {}]   ;;  %s949_s3 = inlined_call_operand.vmem [shape: f32[128,128], index: 3, kind: input, shape index: {}]   ;;  %s950_s4 = inlined_call_operand.vmem [shape: f32[1,128], index: 4, kind: input, shape index: {}]   ;;  %s951_s5 = inlined_call_operand.vmem [shape: f32[128,128], index: 5, kind: output, shape index: {}]  }
   0x1 LB: > { %s609_s19 = sadd.s32 4294967295, %s816_s18   ;;  %p613_p0 = scmp.ge.s32.totalorder %s816_s18, 1  ;;  %s816_s18 = sphi %s848_s18, %s15_s18  }
   0x2   : > { %p188_p1 = scmp.lt.s32.totalorder %s816_s18, 3 }
   0x4   : > { %p189_p2 = pnand %p613_p0, %p188_p1 }
   0x5   : > { %v236_v0 = vld [vmem:[%s947_s1] sm:$0xff] (!%p189_p2)  ;;  %v237_v1 = vld [vmem:[%s947_s1 + $0x8] sm:$0xff] (!%p189_p2)  ;;  %v238_v2 = vld [vmem:[%s947_s1 + $0x10] sm:$0xff] (!%p189_p2)  ;;  %s614_s26 = sshll.u32 (!%p189_p2), %s609_s19, 3  ;;  %vm247_vm0 = vcmask (!%p189_p2), 261120  }
   0x6   : > { %192 = sbr.rel (%p189_p2) target bundleno = 479 (0x1df), region = 40  ;;  %v730_v3 = vpack.c.bf16 (!%p189_p2), %v237_v1, %v236_v0  ;;  %v239_v4 = vld [vmem:[%s947_s1 + $0x18] sm:$0xff] (!%p189_p2)  ;;  %p217_p3 = scmp.lt.s32.totalorder (!%p189_p2), %s614_s26, 15  ;;  %v417_v5 = vld [vmem:[%s949_s3] sm:$0xff] (!%p189_p2)  ;;  %v418_v6 = vld [vmem:[%s949_s3 + $0x8] sm:$0xff] (!%p189_p2) }
   0x7   : > { %v734_v7 = vpack.c.bf16 (!%p189_p2), %v239_v4, %v238_v2  ;;  %v738_v8 = vpack.c.bf16 (!%p189_p2), %v418_v6, %v417_v5  ;;  %v419_v9 = vld [vmem:[%s949_s3 + $0x10] sm:$0xff] (!%p189_p2)  ;;  %v420_v10 = vld [vmem:[%s949_s3 + $0x18] sm:$0xff] (!%p189_p2)  ;;  %v421_v12 = vld [vmem:[%s949_s3 + $0x20] sm:$0xff] (!%p189_p2) }
   0x8   : > { %731 = vmatprep.subr.bf16.mxu0 (!%p189_p2), %v730_v3  ;;  %v742_v11 = vpack.c.bf16 (!%p189_p2), %v420_v10, %v419_v9  ;;  %v422_v13 = vld [vmem:[%s949_s3 + $0x28] sm:$0xff] (!%p189_p2)  ;;  %v423_v23 = vld [vmem:[%s949_s3 + $0x30] sm:$0xff] (!%p189_p2)  ;;  %v424_v24 = vld [vmem:[%s949_s3 + $0x38] sm:$0xff] (!%p189_p2) }
   0x9   : > { %733 = vmatpush3.bf16.msra.mxu0 (!%p189_p2), %v730_v3  ;;  %770 = vmatprep.subr.bf16.mxu1 (!%p189_p2), %v738_v8  ;;  %v746_v16 = vpack.c.bf16 (!%p189_p2), %v422_v13, %v421_v12  ;;  %v750_v25 = vpack.c.bf16 (!%p189_p2), %v424_v24, %v423_v23  ;;  %v425_v26 = vld [vmem:[%s949_s3 + $0x40] sm:$0xff] (!%p189_p2)  ;;  %v426_v27 = vld [vmem:[%s949_s3 + $0x48] sm:$0xff] (!%p189_p2)  ;;  %v427_v29 = vld [vmem:[%s949_s3 + $0x50] sm:$0xff] (!%p189_p2) }
   0xa   : > { %735 = vmatprep.subr.bf16.mxu0 (!%p189_p2), %v734_v7  ;;  %778 = vmatpush3.bf16.msra.mxu1 (!%p189_p2), %v738_v8  ;;  %v754_v28 = vpack.c.bf16 (!%p189_p2), %v426_v27, %v425_v26  ;;  %v428_v30 = vld [vmem:[%s949_s3 + $0x58] sm:$0xff] (!%p189_p2)  ;;  %v429_v32 = vld [vmem:[%s949_s3 + $0x60] sm:$0xff] (!%p189_p2)  ;;  %v430_v33 = vld [vmem:[%s949_s3 + $0x68] sm:$0xff] (!%p189_p2) }
   0xb   : > { %771 = vmatprep.subr.bf16.mxu1 (!%p189_p2), %v742_v11  ;;  %v758_v31 = vpack.c.bf16 (!%p189_p2), %v428_v30, %v427_v29  ;;  %v762_v34 = vpack.c.bf16 (!%p189_p2), %v430_v33, %v429_v32  ;;  %v431_v35 = vld [vmem:[%s949_s3 + $0x70] sm:$0xff] (!%p189_p2)  ;;  %v432_v36 = vld [vmem:[%s949_s3 + $0x78] sm:$0xff] (!%p189_p2)  ;;  %v618_v38 = vld [vmem:[%s948_s2] ss:$0 sm:$0xff] (!%p189_p2) }
   0xc   : > { %v766_v37 = vpack.c.bf16 (!%p189_p2), %v432_v36, %v431_v35 }
   0xd   : > { %s953_s26 = smov (!%p217_p3, %s614_s26), 15  ;;  %737 = vmatpush3.bf16.msra.mxu0 %v734_v7 }
   0xe   : > { %s615_s12 = sshll.u32 %s953_s26, 3  ;;  %739 = vmatprep.subr.bf16.mxu0 %v738_v8  ;;  %779 = vmatpush3.bf16.msra.mxu1 %v742_v11 }
   0xf   : > { %s220_s20 = scalar_lea.vmem %s946_s0, %s615_s12  ;;  %772 = vmatprep.subr.bf16.mxu1 %v746_v16  ;;  %s226_s25 = scalar_lea.vmem %s951_s5, %s615_s12 }
  0x10   : > { %v228_v14 = vld [vmem:[%s220_s20] sm:$0xff]  ;;  %v229_v15 = vld [vmem:[%s220_s20 + $0x8] sm:$0xff]  ;;  %v230_v17 = vld [vmem:[%s220_s20 + $0x10] sm:$0xff] }
  0x11   : > { %674 = vmatprep.mubr.msk.f32.mxu0 %vm247_vm0, %v228_v14  ;;  %v231_v18 = vld [vmem:[%s220_s20 + $0x18] sm:$0xff]  ;;  %v232_v19 = vld [vmem:[%s220_s20 + $0x20] sm:$0xff]  ;;  %v233_v20 = vld [vmem:[%s220_s20 + $0x28] sm:$0xff] }
  0x12   : > { %675 = vmatmul.mubr.msk.f32.vlgmr.msra.gmra.mrb[0].mxu0 %vm247_vm0, %v229_v15  ;;  %780 = vmatpush3.bf16.msra.mxu1 %v746_v16  ;;  %v234_v21 = vld [vmem:[%s220_s20 + $0x30] sm:$0xff]  ;;  %v235_v22 = vld [vmem:[%s220_s20 + $0x38] sm:$0xff] }
  0x13   : > { %677 = vmatprep.mubr.msk.f32.mxu0 %vm247_vm0, %v230_v17  ;;  %741 = vmatpush3.bf16.msra.mxu0 %v738_v8 }
  0x14   : > { %743 = vmatprep.subr.bf16.mxu0 %v742_v11  ;;  %773 = vmatprep.subr.bf16.mxu1 %v750_v25 }
  0x16   : > { %678 = vmatmul.mubr.msk.f32.gmra.mrb[2].mxu0 %vm247_vm0, %v231_v18  ;;  %781 = vmatpush3.bf16.msra.mxu1 %v750_v25 }
  0x17   : > { %680 = vmatprep.mubr.msk.f32.mxu0 %vm247_vm0, %v232_v19  ;;  %745 = vmatpush3.bf16.msra.mxu0 %v742_v11 }
  0x18   : > { %747 = vmatprep.subr.bf16.mxu0 %v746_v16  ;;  %774 = vmatprep.subr.bf16.mxu1 %v754_v28 }
  0x1a   : > { %681 = vmatmul.mubr.msk.f32.gmra.mrb[4].mxu0 %vm247_vm0, %v233_v20  ;;  %782 = vmatpush3.bf16.msra.mxu1 %v754_v28 }
  0x1b   : > { %683 = vmatprep.mubr.msk.f32.mxu0 %vm247_vm0, %v234_v21  ;;  %749 = vmatpush3.bf16.msra.mxu0 %v746_v16 }
  0x1c   : > { %751 = vmatprep.subr.bf16.mxu0 %v750_v25  ;;  %775 = vmatprep.subr.bf16.mxu1 %v758_v31 }
  0x1e   : > { %684 = vmatmul.mubr.msk.f32.gmra.mrb[6].mxu0 %vm247_vm0, %v235_v22  ;;  %783 = vmatpush3.bf16.msra.mxu1 %v758_v31 }
  0x1f   : > { %753 = vmatpush3.bf16.msra.mxu0 %v750_v25  ;;  %776 = vmatprep.subr.bf16.mxu1 %v762_v34 }
  0x20   : > { %755 = vmatprep.subr.bf16.mxu0 %v754_v28 }
  0x22   : > { %784 = vmatpush3.bf16.msra.mxu1 %v762_v34 }
  0x23   : > { %757 = vmatpush3.bf16.msra.mxu0 %v754_v28  ;;  %777 = vmatprep.subr.bf16.mxu1 %v766_v37 }
  0x24   : > { %759 = vmatprep.subr.bf16.mxu0 %v758_v31 }
  0x26   : > { %785 = vmatpush3.bf16.msra.mxu1 %v766_v37 }
  0x27   : > { %761 = vmatpush3.bf16.msra.mxu0 %v758_v31  ;;  %v627_v31 = vld [vmem:[%s950_s4] ss:$0 sm:$0xff] }
  0x28   : > { %763 = vmatprep.subr.bf16.mxu0 %v762_v34 }
  0x2b   : > { %765 = vmatpush3.bf16.msra.mxu0 %v762_v34 }
  0x2c   : > { %767 = vmatprep.subr.bf16.mxu0 %v766_v37 }
  0x2f   : > { %769 = vmatpush3.bf16.msra.mxu0 %v766_v37 }
  0xe5   : > { %v676_v39 = vpop.f32.mrb[0].mxu0 }
  0xe6   : > { %v344_v40 = vadd.f32 %v676_v39, %v618_v38  ;;  %v338_v41 = vpop.f32.mrb[1].mxu0 }
  0xe7   : > { %v339_v42 = vadd.f32 %v618_v38, %v338_v41 }
  0xe8   : > { %v386_v43 = vmul.f32 0.70710677, %v344_v40  ;;  %v378_v4 = vmul.f32 0.5, %v344_v40 }
  0xe9   : > { %v385_v44 = vmul.f32 0.70710677, %v339_v42  ;;  %v679_v45 = vpop.f32.mrb[2].mxu0  ;;  %v377_v2 = vmul.f32 0.5, %v339_v42 }
  0xea   : > { %794 = verf.f32 %v386_v43  ;;  %v354_v46 = vadd.f32 %v679_v45, %v618_v38  ;;  %v348_v47 = vpop.f32.mrb[3].mxu0 }
  0xeb   : > { %796 = verf.f32 %v385_v44  ;;  %v349_v48 = vadd.f32 %v618_v38, %v348_v47 }
  0xec   : > { %v388_v49 = vmul.f32 0.70710677, %v354_v46  ;;  %v380_v12 = vmul.f32 0.5, %v354_v46 }
  0xed   : > { %v387_v50 = vmul.f32 0.70710677, %v349_v48  ;;  %v682_v51 = vpop.f32.mrb[4].mxu0  ;;  %v379_v10 = vmul.f32 0.5, %v349_v48 }
  0xee   : > { %798 = verf.f32 %v388_v49  ;;  %v364_v52 = vadd.f32 %v682_v51, %v618_v38  ;;  %v358_v53 = vpop.f32.mrb[5].mxu0 }
  0xef   : > { %800 = verf.f32 %v387_v50  ;;  %v359_v54 = vadd.f32 %v618_v38, %v358_v53 }
  0xf0   : > { %v390_v55 = vmul.f32 0.70710677, %v364_v52  ;;  %v382_v20 = vmul.f32 0.5, %v364_v52 }
  0xf1   : > { %v389_v56 = vmul.f32 0.70710677, %v359_v54  ;;  %v685_v57 = vpop.f32.mrb[6].mxu0  ;;  %v381_v18 = vmul.f32 0.5, %v359_v54 }
  0xf2   : > { %802 = verf.f32 %v390_v55  ;;  %v374_v58 = vadd.f32 %v685_v57, %v618_v38  ;;  %v368_v59 = vpop.f32.mrb[7].mxu0 }
  0xf3   : > { %804 = verf.f32 %v389_v56  ;;  %v369_v60 = vadd.f32 %v618_v38, %v368_v59 }
  0xf4   : > { %v795_v61 = vpop.eup %794  ;;  %v392_v62 = vmul.f32 0.70710677, %v374_v58  ;;  %v384_v28 = vmul.f32 0.5, %v374_v58 }
  0xf5   : > { %v797_v63 = vpop.eup %796  ;;  %v402_v0 = vadd.f32 1.0, %v795_v61  ;;  %v391_v1 = vmul.f32 0.70710677, %v369_v60  ;;  %v383_v26 = vmul.f32 0.5, %v369_v60 }
  0xf6   : > { %v401_v3 = vadd.f32 1.0, %v797_v63  ;;  %806 = verf.f32 %v392_v62 }
  0xf7   : > { %808 = verf.f32 %v391_v1  ;;  %v410_v8 = vmul.f32 %v402_v0, %v378_v4 }
  0xf8   : > { %v799_v5 = vpop.eup %798  ;;  %v409_v6 = vmul.f32 %v401_v3, %v377_v2 }
  0xf9   : > { %v801_v7 = vpop.eup %800  ;;  %v404_v9 = vadd.f32 1.0, %v799_v5 }
  0xfa   : > { %718 = vmatprep.mubr.f32.mxu0 %v409_v6  ;;  %v403_v11 = vadd.f32 1.0, %v801_v7 }
  0xfb   : > { %719 = vmatmul.mubr.f32.vlgmr.msra.gmra.mrb[8].mxu0 %v410_v8  ;;  %v412_v17 = vmul.f32 %v404_v9, %v380_v12 }
  0xfc   : > { %v803_v13 = vpop.eup %802  ;;  %v411_v14 = vmul.f32 %v403_v11, %v379_v10 }
  0xfd   : > { %v805_v15 = vpop.eup %804  ;;  %v406_v16 = vadd.f32 1.0, %v803_v13 }
  0xfe   : > { %v405_v19 = vadd.f32 1.0, %v805_v15  ;;  %721 = vmatprep.mubr.f32.mxu1 %v411_v14 }
  0xff   : > { %722 = vmatmul.mubr.f32.vlgmr.msra.gmra.mrb[0].mxu1 %v412_v17  ;;  %v414_v25 = vmul.f32 %v406_v16, %v382_v20 }
 0x100   : > { %v807_v21 = vpop.eup %806  ;;  %v413_v22 = vmul.f32 %v405_v19, %v381_v18 }
 0x101   : > { %v809_v23 = vpop.eup %808  ;;  %v408_v24 = vadd.f32 1.0, %v807_v21 }
 0x102   : > { %v407_v27 = vadd.f32 1.0, %v809_v23  ;;  %724 = vmatprep.mubr.f32.mxu1 %v413_v22 }
 0x103   : > { %725 = vmatmul.mubr.f32.gmra.mrb[2].mxu1 %v414_v25  ;;  %v416_v30 = vmul.f32 %v408_v24, %v384_v28 }
 0x104   : > { %v415_v29 = vmul.f32 %v407_v27, %v383_v26 }
 0x106   : > { %727 = vmatprep.mubr.f32.mxu1 %v415_v29 }
 0x107   : > { %728 = vmatmul.mubr.f32.gmra.mrb[4].mxu1 %v416_v30 }
 0x1ce   : > { %v720_v32 = vpop.f32.mrb[8].mxu0 }
 0x1cf   : > { %v512_v33 = vadd.f32 %v720_v32, %v627_v31  ;;  %v506_v34 = vpop.f32.mrb[9].mxu0 }
 0x1d0   : > { %v507_v35 = vadd.f32 %v627_v31, %v506_v34 }
 0x1d1   : > { %546 = vst [vmem:[%s226_s25 + $0x8] sm:$0xff] %v512_v33 }
 0x1d2   : > { %545 = vst [vmem:[%s226_s25] sm:$0xff] %v507_v35  ;;  %v723_v36 = vpop.f32.mrb[0].mxu1 }
 0x1d3   : > { %v522_v37 = vadd.f32 %v723_v36, %v627_v31  ;;  %v516_v38 = vpop.f32.mrb[1].mxu1 }
 0x1d4   : > { %v517_v39 = vadd.f32 %v627_v31, %v516_v38 }
 0x1d5   : > { %548 = vst [vmem:[%s226_s25 + $0x18] sm:$0xff] %v522_v37 }
 0x1d6   : > { %547 = vst [vmem:[%s226_s25 + $0x10] sm:$0xff] %v517_v39  ;;  %v726_v40 = vpop.f32.mrb[2].mxu1 }
 0x1d7   : > { %v532_v41 = vadd.f32 %v726_v40, %v627_v31  ;;  %v526_v42 = vpop.f32.mrb[3].mxu1 }
 0x1d8   : > { %v527_v43 = vadd.f32 %v627_v31, %v526_v42 }
 0x1d9   : > { %550 = vst [vmem:[%s226_s25 + $0x28] sm:$0xff] %v532_v41 }
 0x1da   : > { %549 = vst [vmem:[%s226_s25 + $0x20] sm:$0xff] %v527_v43  ;;  %v729_v44 = vpop.f32.mrb[4].mxu1 }
 0x1db   : > { %v542_v45 = vadd.f32 %v729_v44, %v627_v31  ;;  %v536_v46 = vpop.f32.mrb[5].mxu1 }
 0x1dc   : > { %v537_v47 = vadd.f32 %v627_v31, %v536_v46 }
 0x1dd   : > { %552 = vst [vmem:[%s226_s25 + $0x38] sm:$0xff] %v542_v45 }
 0x1de   : > { %551 = vst [vmem:[%s226_s25 + $0x30] sm:$0xff] %v537_v47 }
 0x1df PF: > { %s15_s18 = sadd.s32 1, %s816_s18  }
 0x1e0   : > { %p12_p4 = scmp.ge.s32.totalorder %s15_s18, 4  }
 0x1e2   :  { %14 = sbr.rel (!%p12_p4) target bundleno = 1 (0x1), region = 70 }

</bundles_post_ra>
